<compile_context>
chip_gen: v6e
topology: v6e:2x2x1
jax: 0.10.0
libtpu: 0.0.40
codegen_flags: <defaults>
</compile_context>

<pallas_src>
import math
from functools import partial

import jax
import jax.numpy as jnp
from jax.experimental import pallas as pl
from jax.experimental.pallas import tpu as pltpu


def _round_up(x, m):
    return ((x + m - 1) // m) * m


def _flash_mha_kernel(q_ref, k_ref, v_ref, wo_ref, bo_ref, o_ref,
                      m_scr, l_scr, acc_scr, *,
                      causal, q_tile, k_tile, kv_len, kv_len_padded):
    """One (batch, query-tile, kv-tile) step of multi-head flash attention.

    All H heads are processed per step via batched (h, ...) einsums; the kv
    grid axis (innermost, "arbitrary") carries the online-softmax state in
    VMEM scratch, and the output projection is fused into the last kv step.
    """
    qi = pl.program_id(1)
    ki = pl.program_id(2)
    n_kv = pl.num_programs(2)
    NEG = jnp.float32(-1e30)   # finite: avoids NaN from exp(-inf - -inf)

    @pl.when(ki == 0)
    def _init():
        m_scr[...] = jnp.full(m_scr.shape, NEG, dtype=m_scr.dtype)
        l_scr[...] = jnp.zeros(l_scr.shape, dtype=l_scr.dtype)
        acc_scr[...] = jnp.zeros(acc_scr.shape, dtype=acc_scr.dtype)

    def _update():
        q = q_ref[0]   # (H, Tq, dh) bf16, 1/sqrt(dh) already folded in
        k = k_ref[0]   # (H, Tk, dh) bf16
        v = v_ref[0]   # (H, Tk, dh) bf16

        s = jnp.einsum('hqd,hkd->hqk', q, k,
                       preferred_element_type=jnp.float32)      # (H, Tq, Tk)

        need_pad_mask = kv_len != kv_len_padded
        if causal or need_pad_mask:
            col = jax.lax.broadcasted_iota(jnp.int32, s.shape, 2) + ki * k_tile
            keep = None
            if need_pad_mask:                    # mask padded key columns
                keep = col < kv_len
            if causal:
                row = (jax.lax.broadcasted_iota(jnp.int32, s.shape, 1)
                       + qi * q_tile)
                ck = col <= row
                keep = ck if keep is None else jnp.logical_and(keep, ck)
            s = jnp.where(keep, s, NEG)

        # Online softmax update (f32).
        m_prev = m_scr[...]                                      # (H, Tq, 1)
        m_new = jnp.maximum(m_prev, jnp.max(s, axis=-1, keepdims=True))
        alpha = jnp.exp(m_prev - m_new)
        p = jnp.exp(s - m_new)
        l_scr[...] = alpha * l_scr[...] + jnp.sum(p, axis=-1, keepdims=True)
        acc_scr[...] = alpha * acc_scr[...] + jnp.einsum(
            'hqk,hkd->hqd', p.astype(jnp.bfloat16), v,
            preferred_element_type=jnp.float32)
        m_scr[...] = m_new

    if causal:
        # Skip KV tiles that lie entirely above the diagonal (~2x fewer FLOPs).
        pl.when(ki * k_tile <= qi * q_tile + (q_tile - 1))(_update)
    else:
        _update()

    @pl.when(ki == n_kv - 1)
    def _finalize():
        inv_l = pl.reciprocal(l_scr[...], approx=True)           # EUP slot
        hv = (acc_scr[...] * inv_l).astype(jnp.bfloat16)         # (H, Tq, dh)
        out = bo_ref[...].astype(jnp.float32)                    # (1, D) -> bcast
        num_heads = wo_ref.shape[0]
        # TODO(synk): group heads into one (Tq, H*dh) x (H*dh, D) matmul once a
        # cheap (H, Tq, dh) -> (Tq, H*dh) relayout is available; these unrolled
        # per-head matmuls run only once per query tile, so the cost is small.
        for h in range(num_heads):
            out = out + jnp.dot(hv[h], wo_ref[h],
                                preferred_element_type=jnp.float32)
        o_ref[0] = out.astype(o_ref.dtype)


def pack_params(params, num_heads):
    """One-time weight re-pack (hoisted out of the forward per perf review).

    Folds 1/sqrt(d_head) into the *query* columns of the fused QKV projection
    (column c of cat([linearQ, linearKV], -1) is a query column iff
    (c mod 3*dh) < dh, matching the module's reshape+chunk head split) and
    pre-shapes/casts the output projection for the kernel.
    """
    D = params['wq'].shape[0]
    dh = D // num_heads
    scale = 1.0 / math.sqrt(dh)
    col = jnp.arange(3 * D)
    col_scale = jnp.where((col % (3 * dh)) < dh, scale, 1.0).astype(jnp.float32)
    return {
        'wq':  params['wq'] * col_scale[:D][None, :],
        'bq':  params['bq'] * col_scale[:D],
        'wkv': params['wkv'] * col_scale[D:][None, :],
        'bkv': params['bkv'] * col_scale[D:],
        'wo_h': params['wo'].reshape(num_heads, dh, D).astype(jnp.bfloat16),
        'bo':  params['bo'].reshape(1, D),
    }


@partial(jax.jit, static_argnames=('num_heads', 'decoder_mask'))
def multi_head_attention(x, packed, *, num_heads, m=None, decoder_mask=False):
    """Pallas forward. x: (B, S, D) float32; m optional (B, S, D)."""
    B, S, D = x.shape
    H = num_heads
    assert D % H == 0
    dh = D // H

    # Fused Q/KV projections as full-width XLA GEMMs (f32), then the module's
    # quirky head split: cat -> (B,S,H,3dh) -> chunk. Scale pre-folded.
    xkv = x if m is None else m
    q_ = x @ packed['wq'] + packed['bq']                 # (B, S, D)
    kv_ = xkv @ packed['wkv'] + packed['bkv']            # (B, S, 2D)
    qkv = jnp.concatenate([q_, kv_], axis=-1).reshape(B, S, H, 3 * dh)
    heads = lambda t: jnp.transpose(t, (0, 2, 1, 3)).astype(jnp.bfloat16)
    q = heads(qkv[..., :dh])                             # (B, H, S, dh) bf16
    k = heads(qkv[..., dh:2 * dh])
    v = heads(qkv[..., 2 * dh:])

    # Flash tiling: keep 128-wide tiles (8-aligned when the whole sequence is
    # tiny); pad the sequence, mask padded keys in-kernel, slice padded rows.
    Tq = Tk = 128 if S >= 128 else _round_up(S, 8)
    S_pad = _round_up(S, Tq)
    if S_pad != S:
        pad = ((0, 0), (0, 0), (0, S_pad - S), (0, 0))
        q, k, v = jnp.pad(q, pad), jnp.pad(k, pad), jnp.pad(v, pad)
    n_q, n_kv = S_pad // Tq, S_pad // Tk

    kernel = partial(_flash_mha_kernel, causal=decoder_mask, q_tile=Tq,
                     k_tile=Tk, kv_len=S, kv_len_padded=S_pad)

    if decoder_mask and Tq == Tk:
        # Clamp the kv block index for fully-masked (skipped) tiles so their
        # DMA degenerates to "block index unchanged" (no HBM traffic).
        kv_index = lambda b, qi, ki: (b, 0, jnp.minimum(ki, qi), 0)
    else:
        kv_index = lambda b, qi, ki: (b, 0, ki, 0)

    out = pl.pallas_call(
        kernel,
        out_shape=jax.ShapeDtypeStruct((B, S_pad, D), x.dtype),
        grid=(B, n_q, n_kv),
        in_specs=[
            pl.BlockSpec((1, H, Tq, dh), lambda b, qi, ki: (b, 0, qi, 0)),  # Q
            pl.BlockSpec((1, H, Tk, dh), kv_index),                         # K
            pl.BlockSpec((1, H, Tk, dh), kv_index),                         # V
            # TODO(synk): on v7x with very large D, request
            # pipeline_mode=pl.Buffered(1) here (block index never changes).
            pl.BlockSpec((H, dh, D), lambda b, qi, ki: (0, 0, 0)),          # Wo
            pl.BlockSpec((1, D), lambda b, qi, ki: (0, 0)),                 # bo
        ],
        out_specs=pl.BlockSpec((1, Tq, D), lambda b, qi, ki: (b, qi, 0)),
        scratch_shapes=[
            pltpu.VMEM((H, Tq, 1), jnp.float32),    # running max
            pltpu.VMEM((H, Tq, 1), jnp.float32),    # running denominator
            pltpu.VMEM((H, Tq, dh), jnp.float32),   # running weighted values
        ],
        compiler_params=pltpu.CompilerParams(
            dimension_semantics=("parallel", "parallel", "arbitrary"),
            vmem_limit_bytes=40 * 1024 * 1024),
    )(q, k, v, packed['wo_h'], packed['bo'])

    return out if S_pad == S else out[:, :S, :]


def mha_reference(x, params, *, num_heads, m=None, decoder_mask=False):
    """Pure-JAX f32 reference mirroring the PyTorch forward exactly."""
    B, S, D = x.shape
    dh = D // num_heads
    xkv = x if m is None else m
    q_ = x @ params['wq'] + params['bq']
    kv_ = xkv @ params['wkv'] + params['bkv']
    qkv = jnp.concatenate([q_, kv_], axis=-1)
    qkv = qkv.reshape(B, S, num_heads, 3 * dh).transpose(0, 2, 1, 3)
    q, k, v = qkv[..., :dh], qkv[..., dh:2 * dh], qkv[..., 2 * dh:]
    s = jnp.einsum('bhqd,bhkd->bhqk', q, k) / math.sqrt(dh)
    if decoder_mask:
        mask = jnp.triu(jnp.full((S, S), -jnp.inf, dtype=jnp.float32), k=1)
        s = s + mask
    a = jax.nn.softmax(s, axis=-1)
    vals = jnp.einsum('bhqk,bhkd->bhqd', a, v)
    nv = vals.transpose(0, 2, 1, 3).reshape(B, S, D)
    return nv @ params['wo'] + params['bo']


def init_params(key, d_model):
    """Deterministic init, same shapes as the nn.Linear layers (stored transposed)."""
    ks = jax.random.split(key, 6)
    bound = 1.0 / math.sqrt(d_model)

    def u(k, shape):
        return jax.random.uniform(k, shape, jnp.float32, -bound, bound)

    return {
        'wq':  u(ks[0], (d_model, d_model)),       # linearQ.weight^T
        'bq':  u(ks[1], (d_model,)),
        'wkv': u(ks[2], (d_model, 2 * d_model)),   # linearKV.weight^T
        'bkv': u(ks[3], (2 * d_model,)),
        'wo':  u(ks[4], (d_model, d_model)),       # linearOut.weight^T
        'bo':  u(ks[5], (d_model,)),
    }


if __name__ == "__main__":
    # Small shapes consistent with the module: seq == max_seq_len.
    B, max_seq_len, d_model, num_heads = 2, 8, 32, 4

    key = jax.random.PRNGKey(0)
    kx, km, kp = jax.random.split(key, 3)
    x = jax.random.normal(kx, (B, max_seq_len, d_model), dtype=jnp.float32)
    mem = jax.random.normal(km, (B, max_seq_len, d_model), dtype=jnp.float32)
    params = init_params(kp, d_model)
    packed = pack_params(params, num_heads)   # one-time weight re-pack

    # bf16 MXU operands + approx reciprocal -> relaxed tolerance vs f32 reference.
    tol = dict(rtol=2e-2, atol=2e-2)

    cases = [
        ("self-attn", None, False),
        ("self-attn + causal mask", None, True),
        ("cross-attn", mem, False),
    ]
    for name, m, dmask in cases:
        out = multi_head_attention(x, packed, num_heads=num_heads,
                                   m=m, decoder_mask=dmask)
        out = jax.block_until_ready(out)
        ref = mha_reference(x, params, num_heads=num_heads,
                            m=m, decoder_mask=dmask)
        if not jnp.allclose(out, ref, **tol):
            err = float(jnp.max(jnp.abs(out - ref)))
            raise AssertionError(f"Pallas kernel mismatch ({name}), max err {err}")

    print("KERNEL_OK")
</pallas_src>

<mosaic_0001>
module attributes {stable_mosaic.version = 11 : i64} {
  func.func @_flash_mha_kernel(%arg0: i32, %arg1: i32, %arg2: i32, %arg3: memref<1x4x8x8xbf16, #tpu.memory_space<vmem>>, %arg4: memref<1x4x8x8xbf16, #tpu.memory_space<vmem>>, %arg5: memref<1x4x8x8xbf16, #tpu.memory_space<vmem>>, %arg6: memref<4x8x32xbf16, #tpu.memory_space<vmem>>, %arg7: memref<1x32xf32, #tpu.memory_space<vmem>>, %arg8: memref<1x8x32xf32, #tpu.memory_space<vmem>>, %arg9: memref<4x8x1xf32, #tpu.memory_space<vmem>>, %arg10: memref<4x8x1xf32, #tpu.memory_space<vmem>>, %arg11: memref<4x8x8xf32, #tpu.memory_space<vmem>>) attributes {dimension_semantics = [#tpu.dimension_semantics<parallel>, #tpu.dimension_semantics<parallel>, #tpu.dimension_semantics<arbitrary>], iteration_bounds = array<i64: 2, 1, 1>, scalar_prefetch = 0 : i64, scratch_operands = 3 : i64, tpu.core_type = #tpu.core_type<tc>, window_params = [{transform_indices = @transform_0, window_bounds = array<i64: 1, 4, 8, 8>}, {transform_indices = @transform_1, window_bounds = array<i64: 1, 4, 8, 8>}, {transform_indices = @transform_2, window_bounds = array<i64: 1, 4, 8, 8>}, {pipeline_mode = #tpu.pipeline_mode<synchronous>, transform_indices = @transform_3, window_bounds = array<i64: 4, 8, 32>}, {pipeline_mode = #tpu.pipeline_mode<synchronous>, transform_indices = @transform_4, window_bounds = array<i64: 1, 32>}, {transform_indices = @transform_5, window_bounds = array<i64: 1, 8, 32>}]} {
    %c0_i32 = arith.constant 0 : i32
    %0 = arith.cmpi eq, %arg2, %c0_i32 : i32
    %1 = arith.extui %0 : i1 to i32
    %cst = arith.constant -1.000000e+30 : f32
    %c0_i32_0 = arith.constant 0 : i32
    %2 = arith.cmpi ne, %1, %c0_i32_0 : i32
    scf.if %2 {
      %36 = vector.broadcast %cst : f32 to vector<4x8x1xf32>
      %c0_36 = arith.constant 0 : index
      %c0_37 = arith.constant 0 : index
      %c0_38 = arith.constant 0 : index
      %37 = vector.load %arg9[%c0_36, %c0_37, %c0_38] : memref<4x8x1xf32, #tpu.memory_space<vmem>>, vector<4x8x1xf32>
      tpu.vector_store %arg9[%c0_36, %c0_37, %c0_38], %36 {strides = array<i32>} : memref<4x8x1xf32, #tpu.memory_space<vmem>>, vector<4x8x1xf32>,
      %cst_39 = arith.constant 0.000000e+00 : f32
      %38 = vector.broadcast %cst_39 : f32 to vector<4x8x1xf32>
      %c0_40 = arith.constant 0 : index
      %c0_41 = arith.constant 0 : index
      %c0_42 = arith.constant 0 : index
      %39 = vector.load %arg10[%c0_40, %c0_41, %c0_42] : memref<4x8x1xf32, #tpu.memory_space<vmem>>, vector<4x8x1xf32>
      tpu.vector_store %arg10[%c0_40, %c0_41, %c0_42], %38 {strides = array<i32>} : memref<4x8x1xf32, #tpu.memory_space<vmem>>, vector<4x8x1xf32>,
      %cst_43 = arith.constant 0.000000e+00 : f32
      %40 = vector.broadcast %cst_43 : f32 to vector<4x8x8xf32>
      %c0_44 = arith.constant 0 : index
      %c0_45 = arith.constant 0 : index
      %c0_46 = arith.constant 0 : index
      %41 = vector.load %arg11[%c0_44, %c0_45, %c0_46] : memref<4x8x8xf32, #tpu.memory_space<vmem>>, vector<4x8x8xf32>
      tpu.vector_store %arg11[%c0_44, %c0_45, %c0_46], %40 {strides = array<i32>} : memref<4x8x8xf32, #tpu.memory_space<vmem>>, vector<4x8x8xf32>,
    } else {
    }
    %c0 = arith.constant 0 : index
    %c0_1 = arith.constant 0 : index
    %c0_2 = arith.constant 0 : index
    %c0_3 = arith.constant 0 : index
    %3 = vector.load %arg3[%c0, %c0_1, %c0_2, %c0_3] : memref<1x4x8x8xbf16, #tpu.memory_space<vmem>>, vector<1x4x8x8xbf16>
    %4 = vector.shape_cast %3 : vector<1x4x8x8xbf16> to vector<4x8x8xbf16>
    %c0_4 = arith.constant 0 : index
    %c0_5 = arith.constant 0 : index
    %c0_6 = arith.constant 0 : index
    %c0_7 = arith.constant 0 : index
    %5 = vector.load %arg4[%c0_4, %c0_5, %c0_6, %c0_7] : memref<1x4x8x8xbf16, #tpu.memory_space<vmem>>, vector<1x4x8x8xbf16>
    %6 = vector.shape_cast %5 : vector<1x4x8x8xbf16> to vector<4x8x8xbf16>
    %c0_8 = arith.constant 0 : index
    %c0_9 = arith.constant 0 : index
    %c0_10 = arith.constant 0 : index
    %c0_11 = arith.constant 0 : index
    %7 = vector.load %arg5[%c0_8, %c0_9, %c0_10, %c0_11] : memref<1x4x8x8xbf16, #tpu.memory_space<vmem>>, vector<1x4x8x8xbf16>
    %8 = vector.shape_cast %7 : vector<1x4x8x8xbf16> to vector<4x8x8xbf16>
    "tpu.trace_start"() <{level = 10 : i32, message = "hqd,hkd->hqk"}> : () -> ()
    %cst_12 = arith.constant dense<0.000000e+00> : vector<4x8x8xf32>
    %9 = tpu.matmul %4, %6, %cst_12 {dimension_numbers = #tpu.dot_dimension_numbers<[2], [2], [1], [1], [0, 0, 0, 1, 1, 1], [0], [0]>} : vector<4x8x8xbf16>, vector<4x8x8xbf16>, vector<4x8x8xf32> -> vector<4x8x8xf32>
    "tpu.trace_stop"() : () -> ()
    %c0_13 = arith.constant 0 : index
    %c0_14 = arith.constant 0 : index
    %c0_15 = arith.constant 0 : index
    %10 = vector.load %arg9[%c0_13, %c0_14, %c0_15] : memref<4x8x1xf32, #tpu.memory_space<vmem>>, vector<4x8x1xf32>
    %cst_16 = arith.constant dense<0xFF800000> : vector<4x8xf32>
    %11 = vector.multi_reduction <maximumf>, %9, %cst_16 [2] : vector<4x8x8xf32> to vector<4x8xf32>
    %12 = vector.shape_cast %11 : vector<4x8xf32> to vector<4x8x1xf32>
    %13 = arith.maximumf %10, %12 : vector<4x8x1xf32>
    %14 = arith.subf %10, %13 : vector<4x8x1xf32>
    %15 = math.exp %14 : vector<4x8x1xf32>
    %16 = vector.broadcast %13 : vector<4x8x1xf32> to vector<4x8x8xf32>
    %17 = arith.subf %9, %16 : vector<4x8x8xf32>
    %18 = math.exp %17 : vector<4x8x8xf32>
    %c0_17 = arith.constant 0 : index
    %c0_18 = arith.constant 0 : index
    %c0_19 = arith.constant 0 : index
    %19 = vector.load %arg10[%c0_17, %c0_18, %c0_19] : memref<4x8x1xf32, #tpu.memory_space<vmem>>, vector<4x8x1xf32>
    %20 = arith.mulf %15, %19 : vector<4x8x1xf32>
    %cst_20 = arith.constant dense<0.000000e+00> : vector<4x8xf32>
    %21 = vector.multi_reduction <add>, %18, %cst_20 [2] : vector<4x8x8xf32> to vector<4x8xf32>
    %22 = vector.shape_cast %21 : vector<4x8xf32> to vector<4x8x1xf32>
    %23 = arith.addf %20, %22 : vector<4x8x1xf32>
    %c0_21 = arith.constant 0 : index
    %c0_22 = arith.constant 0 : index
    %c0_23 = arith.constant 0 : index
    %24 = vector.load %arg10[%c0_21, %c0_22, %c0_23] : memref<4x8x1xf32, #tpu.memory_space<vmem>>, vector<4x8x1xf32>
    tpu.vector_store %arg10[%c0_21, %c0_22, %c0_23], %23 {strides = array<i32>} : memref<4x8x1xf32, #tpu.memory_space<vmem>>, vector<4x8x1xf32>,
    %c0_24 = arith.constant 0 : index
    %c0_25 = arith.constant 0 : index
    %c0_26 = arith.constant 0 : index
    %25 = vector.load %arg11[%c0_24, %c0_25, %c0_26] : memref<4x8x8xf32, #tpu.memory_space<vmem>>, vector<4x8x8xf32>
    %26 = vector.broadcast %15 : vector<4x8x1xf32> to vector<4x8x8xf32>
    %27 = arith.mulf %26, %25 : vector<4x8x8xf32>
    %28 = arith.truncf %18 : vector<4x8x8xf32> to vector<4x8x8xbf16>
    "tpu.trace_start"() <{level = 10 : i32, message = "hqk,hkd->hqd"}> : () -> ()
    %cst_27 = arith.constant dense<0.000000e+00> : vector<4x8x8xf32>
    %29 = tpu.matmul %28, %8, %cst_27 {dimension_numbers = #tpu.dot_dimension_numbers<[2], [1], [1], [2], [0, 0, 0, 1, 1, 2], [0], [0]>} : vector<4x8x8xbf16>, vector<4x8x8xbf16>, vector<4x8x8xf32> -> vector<4x8x8xf32>
    "tpu.trace_stop"() : () -> ()
    %30 = arith.addf %27, %29 : vector<4x8x8xf32>
    %c0_28 = arith.constant 0 : index
    %c0_29 = arith.constant 0 : index
    %c0_30 = arith.constant 0 : index
    %31 = vector.load %arg11[%c0_28, %c0_29, %c0_30] : memref<4x8x8xf32, #tpu.memory_space<vmem>>, vector<4x8x8xf32>
    tpu.vector_store %arg11[%c0_28, %c0_29, %c0_30], %30 {strides = array<i32>} : memref<4x8x8xf32, #tpu.memory_space<vmem>>, vector<4x8x8xf32>,
    %c0_31 = arith.constant 0 : index
    %c0_32 = arith.constant 0 : index
    %c0_33 = arith.constant 0 : index
    %32 = vector.load %arg9[%c0_31, %c0_32, %c0_33] : memref<4x8x1xf32, #tpu.memory_space<vmem>>, vector<4x8x1xf32>
    tpu.vector_store %arg9[%c0_31, %c0_32, %c0_33], %13 {strides = array<i32>} : memref<4x8x1xf32, #tpu.memory_space<vmem>>, vector<4x8x1xf32>,
    %c0_i32_34 = arith.constant 0 : i32
    %33 = arith.cmpi eq, %arg2, %c0_i32_34 : i32
    %34 = arith.extui %33 : i1 to i32
    %c0_i32_35 = arith.constant 0 : i32
    %35 = arith.cmpi ne, %34, %c0_i32_35 : i32
    scf.if %35 {
      %c0_36 = arith.constant 0 : index
      %c0_37 = arith.constant 0 : index
      %c0_38 = arith.constant 0 : index
      %36 = vector.load %arg10[%c0_36, %c0_37, %c0_38] : memref<4x8x1xf32, #tpu.memory_space<vmem>>, vector<4x8x1xf32>
      %37 = tpu.reciprocal %36 {approx = true} : vector<4x8x1xf32> -> vector<4x8x1xf32>
      %c0_39 = arith.constant 0 : index
      %c0_40 = arith.constant 0 : index
      %c0_41 = arith.constant 0 : index
      %38 = vector.load %arg11[%c0_39, %c0_40, %c0_41] : memref<4x8x8xf32, #tpu.memory_space<vmem>>, vector<4x8x8xf32>
      %39 = vector.broadcast %37 : vector<4x8x1xf32> to vector<4x8x8xf32>
      %40 = arith.mulf %38, %39 : vector<4x8x8xf32>
      %41 = arith.truncf %40 : vector<4x8x8xf32> to vector<4x8x8xbf16>
      %c0_42 = arith.constant 0 : index
      %c0_43 = arith.constant 0 : index
      %42 = vector.load %arg7[%c0_42, %c0_43] : memref<1x32xf32, #tpu.memory_space<vmem>>, vector<1x32xf32>
      %43 = vector.extract_strided_slice %41 {offsets = [0, 0, 0], sizes = [1, 8, 8], strides = [1, 1, 1]} : vector<4x8x8xbf16> to vector<1x8x8xbf16>
      %44 = vector.shape_cast %43 : vector<1x8x8xbf16> to vector<8x8xbf16>
      %c0_44 = arith.constant 0 : index
      %c0_45 = arith.constant 0 : index
      %c0_46 = arith.constant 0 : index
      %45 = vector.load %arg6[%c0_44, %c0_45, %c0_46] : memref<4x8x32xbf16, #tpu.memory_space<vmem>>, vector<1x8x32xbf16>
      %46 = vector.shape_cast %45 : vector<1x8x32xbf16> to vector<8x32xbf16>
      %cst_47 = arith.constant dense<0.000000e+00> : vector<8x32xf32>
      %47 = tpu.matmul %44, %46, %cst_47 {dimension_numbers = #tpu.dot_dimension_numbers<[1], [0], [0], [1], [0, 0, 1, 1], [], []>} : vector<8x8xbf16>, vector<8x32xbf16>, vector<8x32xf32> -> vector<8x32xf32>
      %48 = vector.broadcast %42 : vector<1x32xf32> to vector<8x32xf32>
      %49 = arith.addf %48, %47 : vector<8x32xf32>
      %50 = vector.extract_strided_slice %41 {offsets = [1, 0, 0], sizes = [1, 8, 8], strides = [1, 1, 1]} : vector<4x8x8xbf16> to vector<1x8x8xbf16>
      %51 = vector.shape_cast %50 : vector<1x8x8xbf16> to vector<8x8xbf16>
      %c1 = arith.constant 1 : index
      %c0_48 = arith.constant 0 : index
      %c0_49 = arith.constant 0 : index
      %52 = vector.load %arg6[%c1, %c0_48, %c0_49] : memref<4x8x32xbf16, #tpu.memory_space<vmem>>, vector<1x8x32xbf16>
      %53 = vector.shape_cast %52 : vector<1x8x32xbf16> to vector<8x32xbf16>
      %cst_50 = arith.constant dense<0.000000e+00> : vector<8x32xf32>
      %54 = tpu.matmul %51, %53, %cst_50 {dimension_numbers = #tpu.dot_dimension_numbers<[1], [0], [0], [1], [0, 0, 1, 1], [], []>} : vector<8x8xbf16>, vector<8x32xbf16>, vector<8x32xf32> -> vector<8x32xf32>
      %55 = arith.addf %49, %54 : vector<8x32xf32>
      %56 = vector.extract_strided_slice %41 {offsets = [2, 0, 0], sizes = [1, 8, 8], strides = [1, 1, 1]} : vector<4x8x8xbf16> to vector<1x8x8xbf16>
      %57 = vector.shape_cast %56 : vector<1x8x8xbf16> to vector<8x8xbf16>
      %c2 = arith.constant 2 : index
      %c0_51 = arith.constant 0 : index
      %c0_52 = arith.constant 0 : index
      %58 = vector.load %arg6[%c2, %c0_51, %c0_52] : memref<4x8x32xbf16, #tpu.memory_space<vmem>>, vector<1x8x32xbf16>
      %59 = vector.shape_cast %58 : vector<1x8x32xbf16> to vector<8x32xbf16>
      %cst_53 = arith.constant dense<0.000000e+00> : vector<8x32xf32>
      %60 = tpu.matmul %57, %59, %cst_53 {dimension_numbers = #tpu.dot_dimension_numbers<[1], [0], [0], [1], [0, 0, 1, 1], [], []>} : vector<8x8xbf16>, vector<8x32xbf16>, vector<8x32xf32> -> vector<8x32xf32>
      %61 = arith.addf %55, %60 : vector<8x32xf32>
      %62 = vector.extract_strided_slice %41 {offsets = [3, 0, 0], sizes = [1, 8, 8], strides = [1, 1, 1]} : vector<4x8x8xbf16> to vector<1x8x8xbf16>
      %63 = vector.shape_cast %62 : vector<1x8x8xbf16> to vector<8x8xbf16>
      %c3 = arith.constant 3 : index
      %c0_54 = arith.constant 0 : index
      %c0_55 = arith.constant 0 : index
      %64 = vector.load %arg6[%c3, %c0_54, %c0_55] : memref<4x8x32xbf16, #tpu.memory_space<vmem>>, vector<1x8x32xbf16>
      %65 = vector.shape_cast %64 : vector<1x8x32xbf16> to vector<8x32xbf16>
      %cst_56 = arith.constant dense<0.000000e+00> : vector<8x32xf32>
      %66 = tpu.matmul %63, %65, %cst_56 {dimension_numbers = #tpu.dot_dimension_numbers<[1], [0], [0], [1], [0, 0, 1, 1], [], []>} : vector<8x8xbf16>, vector<8x32xbf16>, vector<8x32xf32> -> vector<8x32xf32>
      %67 = arith.addf %61, %66 : vector<8x32xf32>
      %c0_57 = arith.constant 0 : index
      %c0_58 = arith.constant 0 : index
      %c0_59 = arith.constant 0 : index
      %68 = vector.load %arg8[%c0_57, %c0_58, %c0_59] : memref<1x8x32xf32, #tpu.memory_space<vmem>>, vector<1x8x32xf32>
      %69 = vector.shape_cast %68 : vector<1x8x32xf32> to vector<8x32xf32>
      %70 = vector.shape_cast %67 : vector<8x32xf32> to vector<1x8x32xf32>
      tpu.vector_store %arg8[%c0_57, %c0_58, %c0_59], %70 {strides = array<i32>} : memref<1x8x32xf32, #tpu.memory_space<vmem>>, vector<1x8x32xf32>,
    } else {
    }
    return
  }
  func.func @transform_0(%arg0: i32, %arg1: i32, %arg2: i32) -> (i32, i32, i32, i32) {
    %c0_i32 = arith.constant 0 : i32
    %c0_i32_0 = arith.constant 0 : i32
    %c0_i32_1 = arith.constant 0 : i32
    return %arg0, %c0_i32, %arg1, %c0_i32_0 : i32, i32, i32, i32
  }
  func.func @transform_1(%arg0: i32, %arg1: i32, %arg2: i32) -> (i32, i32, i32, i32) {
    %c0_i32 = arith.constant 0 : i32
    %c0_i32_0 = arith.constant 0 : i32
    %c0_i32_1 = arith.constant 0 : i32
    return %arg0, %c0_i32, %arg2, %c0_i32_0 : i32, i32, i32, i32
  }
  func.func @transform_2(%arg0: i32, %arg1: i32, %arg2: i32) -> (i32, i32, i32, i32) {
    %c0_i32 = arith.constant 0 : i32
    %c0_i32_0 = arith.constant 0 : i32
    %c0_i32_1 = arith.constant 0 : i32
    return %arg0, %c0_i32, %arg2, %c0_i32_0 : i32, i32, i32, i32
  }
  func.func @transform_3(%arg0: i32, %arg1: i32, %arg2: i32) -> (i32, i32, i32) {
    %c0_i32 = arith.constant 0 : i32
    %c0_i32_0 = arith.constant 0 : i32
    %c0_i32_1 = arith.constant 0 : i32
    %c0_i32_2 = arith.constant 0 : i32
    return %c0_i32, %c0_i32_0, %c0_i32_1 : i32, i32, i32
  }
  func.func @transform_4(%arg0: i32, %arg1: i32, %arg2: i32) -> (i32, i32) {
    %c0_i32 = arith.constant 0 : i32
    %c0_i32_0 = arith.constant 0 : i32
    %c0_i32_1 = arith.constant 0 : i32
    return %c0_i32, %c0_i32_0 : i32, i32
  }
  func.func @transform_5(%arg0: i32, %arg1: i32, %arg2: i32) -> (i32, i32, i32) {
    %c0_i32 = arith.constant 0 : i32
    %c0_i32_0 = arith.constant 0 : i32
    return %arg0, %arg1, %c0_i32 : i32, i32, i32
  }
}

</mosaic_0001>

<bundles_post_ra>
// kernel: multi_head_attention.1
= control target key start
LH: loop header
LB: loop body
LE: loop exit
PB: predicated region body
PF: predicated region fallthrough
CT: control target
= control target key end

     0   :  { %10 = vsyncpa [#allocation6], 0  ;;  %s1855_s0 = inlined_call_operand.vmem [shape: bf16[2,4,8,8], index: 0, kind: input, shape index: {}]   ;;  %s1856_s1 = inlined_call_operand.vmem [shape: bf16[2,4,8,8], index: 1, kind: input, shape index: {}]   ;;  %s1857_s2 = inlined_call_operand.vmem [shape: bf16[2,4,8,8], index: 2, kind: input, shape index: {}]   ;;  %s1858_s3 = inlined_call_operand.vmem [shape: bf16[4,8,32], index: 3, kind: input, shape index: {}]   ;;  %s1859_s4 = inlined_call_operand.vmem [shape: f32[1,32], index: 4, kind: input, shape index: {}]   ;;  %s1860_s5 = inlined_call_operand.hbm [shape: f32[2,8,32], index: 5, kind: output, shape index: {}]  }
   0x1   :  { %12 = vsyncpa [#allocation6 + $0x1], 0  ;;  %s1559_s18 = smov 0   ;;  %s1561_s19 = smov 0  }
   0x2   :  { %s1563_s20 = smov 0   ;;  %s1565_s21 = smov 0  }
   0x3   :  { %s1567_s22 = smov 0   ;;  %s1569_s23 = smov 0  }
   0x4 LB: > { %s1230_s24 = sadd.s32 4294967295, %s1522_s23   ;;  %s1231_s25 = sadd.s32 4294967294, %s1522_s23   ;;  %s1522_s23 = sphi %s1569_s23, %s18_s23   ;;  %s1518_s22 = sphi %s1567_s22, %s1867_s22   ;;  %s1514_s21 = sphi %s1565_s21, %s1866_s21   ;;  %s1510_s20 = sphi %s1563_s20, %s1865_s20   ;;  %s1506_s19 = sphi %s1561_s19, %s1864_s19   ;;  %s1502_s18 = sphi %s1559_s18, %s1863_s18  }
   0x5   : > { %s37_s26 = sadd.s32 1, %s1518_s22  ;;  %s172_s27 = sadd.s32 1, %s1510_s20 }
   0x6   : > { %p39_p0 = scmp.ge.s32.totalorder %s37_s26, 2  ;;  %p182_p1 = scmp.ne.s32.totalorder %s1510_s20, %s1506_s19 }
   0x7   : > { %p183_p2 = scmp.eq.s32.totalorder %s1230_s24, 1  ;;  %p188_p3 = scmp.ne.s32.totalorder %s1506_s19, %s1502_s18 }
   0x8   : > { %s1869_s26 = smov (%p39_p0, %s37_s26), 0  ;;  %p189_p5 = scmp.eq.s32.totalorder %s1231_s25, 1 }
   0x9   : > { %p1599_p4 = por %p183_p2, %p182_p1  ;;  %s167_s29 = ssub.s32 %s1518_s22, %s1869_s26 }
   0xa   : > { %p1234_p6 = scmp.ge.s32.totalorder %s1522_s23, 1  ;;  %p170_p7 = scmp.eq.s32.totalorder %s167_s29, 0 }
   0xb   : > { %p1606_p8 = por %p189_p5, %p188_p3  ;;  %p246_p9 = scmp.lt.s32.totalorder %s1522_s23, 3 }
   0xc   : > { %s1612_s6 = scalar_select %p170_p7, %s1510_s20, %s172_s27  }
   0xd   : > { %p247_p10 = pnand %p1234_p6, %p246_p9 }
   0xe   : > { %p293_p11 = scmp.lt.s32.totalorder (!%p247_p10), %s1514_s21, 1  ;;  %s1259_s15 = sshll.u32 (!%p247_p10), %s1514_s21, 7 }
   0xf   : > { %250 = sbr.rel (%p247_p10) target bundleno = 1021 (0x3fd), region = 40  ;;  %s1809_s27 = scalar_lea.hbm (!%p247_p10), %s1860_s5, %s1259_s15 }
  0x14   : > { %vm331_vm0 = vcmask 64512   ;;  %v1524_v0 = vmov 0.0   ;;  %s294_s7 = scalar_select %p293_p11, %s1514_s21, 1  ;;  %vm1525_vm1 = vmmov 0   ;;  %vm322_vm2 = vcmask 7168  }
  0x15   : > { %1289 = vmatprep.subr.bf16.mxu0 %v1524_v0  ;;  %1295 = vmatprep.subr.bf16.mxu1 %v1524_v0  ;;  %332 = vst.msk [vmem:[#allocation4] sm:$0xff] %vm331_vm0, %v1524_v0  ;;  %333 = vst.msk [vmem:[#allocation4 + $0x8] sm:$0xff] %vm331_vm0, %v1524_v0  ;;  %v1526_v13 = vmov -1e+30   ;;  %v1527_v32 = vmov 0   ;;  %vm661_vm3 = vcmask 1043456  }
  0x16   : > { %334 = vst.msk [vmem:[#allocation4 + $0x10] sm:$0xff] %vm331_vm0, %v1524_v0  ;;  %335 = vst.msk [vmem:[#allocation4 + $0x18] sm:$0xff] %vm331_vm0, %v1524_v0  ;;  %1291 = vmatprep.mubr.msk.bf16.mxu0 %vm1525_vm1, %v1524_v0  ;;  %1297 = vmatprep.mubr.msk.bf16.mxu1 %vm1525_vm1, %v1524_v0  ;;  %s1630_s8 = sshll.u32 %s294_s7, 4  ;;  %vm1100_vm4 = vcmask 261120   ;;  %s1528_s7 = smov [#allocation5]  }
  0x17   : > { %s308_s11 = scalar_lea.vmem %s1856_s1, %s1630_s8  ;;  %s300_s14 = scalar_lea.vmem %s1855_s0, %s1630_s8  ;;  %323 = vst.msk [vmem:[#allocation2] sm:$0xff] %vm322_vm2, %v1526_v13  ;;  %324 = vst.msk [vmem:[#allocation2 + $0x8] sm:$0xff] %vm322_vm2, %v1526_v13  ;;  %1420 = vset.pattern.permute.xlu0 %v1527_v32  ;;  %1421 = vset.pattern.permute.xlu1 %v1527_v32 }
  0x18   : > { %v340_v1 = vld [vmem:[%s308_s11] sm:$0xf]  ;;  %v341_v2 = vld [vmem:[%s308_s11 + $0x4] sm:$0xf]  ;;  %v342_v5 = vld [vmem:[%s308_s11 + $0x8] sm:$0xf]  ;;  %s1721_s17 = scalar_lea.vmem %s1857_s2, %s1630_s8 }
  0x19   : > { %v353_v3 = vsel %vm331_vm0, %v340_v1, 0  ;;  %v399_v4 = vsel %vm331_vm0, %v341_v2, 0  ;;  %v343_v6 = vld [vmem:[%s308_s11 + $0xc] sm:$0xf]  ;;  %v336_v7 = vld [vmem:[%s300_s14] sm:$0xf] }
  0x1a   : > { %1290 = vmatpush3.bf16.xpose.msra.mxu0 %v353_v3  ;;  %1296 = vmatpush3.bf16.xpose.msra.mxu1 %v399_v4  ;;  %v337_v8 = vld [vmem:[%s300_s14 + $0x4] sm:$0xf]  ;;  %v445_v9 = vsel %vm331_vm0, %v342_v5, 0  ;;  %v491_v10 = vsel %vm331_vm0, %v343_v6, 0  ;;  %v338_v11 = vld [vmem:[%s300_s14 + $0x8] sm:$0xf] }
  0x1b   : > { %1301 = vmatprep.subr.bf16.mxu0 %v1524_v0  ;;  %1307 = vmatprep.subr.bf16.mxu1 %v1524_v0  ;;  %v339_v12 = vld [vmem:[%s300_s14 + $0xc] sm:$0xf]  ;;  %325 = vst.msk [vmem:[#allocation2 + $0x10] sm:$0xff] %vm322_vm2, %v1526_v13  ;;  %326 = vst.msk [vmem:[#allocation2 + $0x18] sm:$0xff] %vm322_vm2, %v1526_v13  ;;  %v344_v50 = vld [vmem:[%s1721_s17] sm:$0xf] }
  0x1c   : > { %327 = vst.msk [vmem:[#allocation3] sm:$0xff] %vm322_vm2, %v1524_v0  ;;  %328 = vst.msk [vmem:[#allocation3 + $0x8] sm:$0xff] %vm322_vm2, %v1524_v0  ;;  %v663_v52 = vsel %vm661_vm3, %v344_v50, 0  ;;  %v345_v53 = vld [vmem:[%s1721_s17 + $0x4] sm:$0xf]  ;;  %s290_s11 = sand.u32 1, %s1506_s19  }
  0x1d   : > { %329 = vst.msk [vmem:[#allocation3 + $0x10] sm:$0xff] %vm322_vm2, %v1524_v0  ;;  %330 = vst.msk [vmem:[#allocation3 + $0x18] sm:$0xff] %vm322_vm2, %v1524_v0  ;;  %v709_v54 = vsel %vm661_vm3, %v345_v53, 0  ;;  %v346_v4 = vld [vmem:[%s1721_s17 + $0x8] sm:$0xf]  ;;  %s1235_s14 = sshll.u32 %s290_s11, 3 }
  0x1e   : > { %v1682_v35 = vld [vmem:[#allocation2] sm:$0xff]  ;;  %v1687_v38 = vld [vmem:[#allocation2 + $0x8] sm:$0xff]  ;;  %s292_s16 = scalar_lea.vmem [#allocation5], %s1235_s14  ;;  %s1103_s21 = scalar_lea.sflag [#allocation6], %s290_s11 }
  0x1f   : > { %v1252_v50 = vld [vmem:[%s1858_s3 + $0x4] sm:$0xf]  ;;  %s1450_s8 = sshll.u32 %s1528_s7, 4  ;;  %s1451_s8 = int_to_ptr.vmem [resolvable:$false] %s1450_s8 }
  0x20   : > { %s1452_s9 = scalar_lea.vmem %s1451_s8, 256 }
  0x21   : > { %1292 = vmatmul.mubr.msk.bf16.vlgmr.msra.gmra.mxu0 %vm331_vm0, %v336_v7  ;;  %1298 = vmatmul.mubr.msk.bf16.vlgmr.msra.gmra.mxu1 %vm331_vm0, %v337_v8  ;;  %v755_v8 = vsel %vm661_vm3, %v346_v4, 0 }
  0x22   : > { %1302 = vmatpush3.bf16.xpose.msra.mxu0 %v445_v9  ;;  %1308 = vmatpush3.bf16.xpose.msra.mxu1 %v491_v10  ;;  %v1697_v42 = vld [vmem:[#allocation2 + $0x10] sm:$0xff]  ;;  %v1707_v46 = vld [vmem:[#allocation2 + $0x18] sm:$0xff]  ;;  %v347_v9 = vld [vmem:[%s1721_s17 + $0xc] sm:$0xf]  ;;  %s1117_s17 = sshll.u32 %s292_s16, 4  ;;  %s1811_s17 = int_to_ptr.vmem [resolvable:$true] %s1117_s17 }
  0x23   : > { %1303 = vmatprep.mubr.msk.bf16.mxu0 %vm1525_vm1, %v1524_v0  ;;  %1309 = vmatprep.mubr.msk.bf16.mxu1 %vm1525_vm1, %v1524_v0  ;;  %v801_v13 = vsel %vm661_vm3, %v347_v9, 0  ;;  %s1446_s29 = scalar_lea.vmem %s1811_s17, 128  ;;  %p1453_p1 = scmp.lt.s32.totalorder %s1811_s17, %s1451_s8 }
  0x24   : > { %1313 = vmatprep.subr.bf16.mxu0 %v1524_v0  ;;  %1319 = vmatprep.subr.bf16.mxu1 %v1524_v0  ;;  %p1447_p12 = scmp.ne.s32.totalorder %s1811_s17, %s1446_s29  ;;  %p1454_p2 = scmp.lt.s32.totalorder %s1452_s9, %s1446_s29 }
  0x26   : > { %p1448_p13 = pnand %p1447_p12, %p1599_p4  ;;  %p1455_p3 = por %p1454_p2, %p1453_p1 }
  0x28   : > { %p1449_p0 = pneg %p1448_p13 }
  0x29   : > { %1304 = vmatmul.mubr.msk.bf16.vlgmr.msra.gmra.mxu0 %vm331_vm0, %v338_v11  ;;  %1310 = vmatmul.mubr.msk.bf16.vlgmr.msra.gmra.mxu1 %vm331_vm0, %v339_v12 }
  0x2a   : > { %1315 = vmatprep.mubr.msk.bf16.mxu0 %vm1525_vm1, %v1524_v0  ;;  %1321 = vmatprep.mubr.msk.bf16.mxu1 %vm1525_vm1, %v1524_v0  ;;  %p1456_p5 = pnand %p1455_p3, %p1449_p0 }
  0x2b   : > { %1314 = vmatpush3.bf16.msra.mxu0 %v663_v52  ;;  %1320 = vmatpush3.bf16.msra.mxu1 %v709_v54  ;;  %v959_v52 = vsel %vm661_vm3, %v1252_v50, 0 }
  0x2c   : > { %1325 = vmatprep.subr.bf16.mxu0 %v1524_v0  ;;  %1331 = vmatprep.subr.bf16.mxu1 %v1524_v0 }
  0xe1   : > { %v1672_v14 = vpop.f32.mrf.mxu0  ;;  %v1674_v15 = vpop.f32.mrf.mxu1 }
  0xe2   : > { %v537_v16 = vsel %vm331_vm0, %v1672_v14, -inf  ;;  %v540_v19 = vsel %vm331_vm0, %v1674_v15, -inf }
  0xe3   : > { %v1299_v17 = vpop.f32.mrf.mxu1  ;;  %538 = vmax.xlane.f32.xlu0 %v537_v16  ;;  %v1293_v18 = vpop.f32.mrf.mxu0 }
  0xe5   : > { %v392_v20 = vpop.f32.mrf.mxu0  ;;  %v438_v21 = vpop.f32.mrf.mxu1 }
  0xe7   : > { %v1300_v22 = vpop.f32.mrf.mxu1  ;;  %541 = vmax.xlane.f32.xlu0 %v540_v19  ;;  %v1294_v23 = vpop.f32.mrf.mxu0 }
  0xe9   : > { %v481_v24 = vpop.f32.mrf.mxu0  ;;  %v527_v25 = vpop.f32.mrf.mxu1 }
  0xea   : > { %v543_v26 = vsel %vm331_vm0, %v481_v24, -inf  ;;  %v546_v29 = vsel %vm331_vm0, %v527_v25, -inf }
  0xeb   : > { %v1311_v27 = vpop.f32.mrf.mxu1  ;;  %544 = vmax.xlane.f32.xlu1 %v543_v26  ;;  %v1305_v28 = vpop.f32.mrf.mxu0 }
  0xec   : > { %v597_v28 = vld [vmem:[#allocation3] sm:$0xff] }
  0xed   : > { %v484_v30 = vpop.f32.mrf.mxu0  ;;  %v530_v31 = vpop.f32.mrf.mxu1 }
  0xee   : > { %v598_v31 = vld [vmem:[#allocation3 + $0x8] sm:$0xff] }
  0xef   : > { %v1312_v33 = vpop.f32.mrf.mxu1  ;;  %547 = vmax.xlane.f32.xlu1 %v546_v29  ;;  %v1306_v34 = vpop.f32.mrf.mxu0 }
 0x16c   : > { %v539_v36 = vpop.xlane.xlu0 %538 }
 0x16d   : > { %v1685_v37 = vmax.f32 %v1682_v35, %v539_v36 }
 0x16f   : > { %v553_v39 = vsub.f32 %v1682_v35, %v1685_v37  ;;  %851 = vst.msk [vmem:[#allocation2] sm:$0xff] %vm322_vm2, %v1685_v37  ;;  %567 = vperm.xlu0 %1420, %v1685_v37   ;;  %v599_v35 = vld [vmem:[#allocation3 + $0x10] sm:$0xff] }
 0x170   : > { %v542_v40 = vpop.xlane.xlu0 %541 }
 0x171   : > { %v1695_v41 = vmax.f32 %v1687_v38, %v542_v40  ;;  %v557_v19 = vmul.f32 1.442695, %v553_v39  ;;  %v600_v39 = vld [vmem:[#allocation3 + $0x18] sm:$0xff] }
 0x173   : > { %v554_v43 = vsub.f32 %v1687_v38, %v1695_v41  ;;  %852 = vst.msk [vmem:[#allocation2 + $0x8] sm:$0xff] %vm322_vm2, %v1695_v41  ;;  %572 = vperm.xlu1 %1421, %v1695_v41  }
 0x174   : > { %v545_v44 = vpop.xlane.xlu1 %544 }
 0x175   : > { %v1705_v45 = vmax.f32 %v1697_v42, %v545_v44  ;;  %v559_v17 = vmul.f32 1.442695, %v554_v43 }
 0x177   : > { %v555_v47 = vsub.f32 %v1697_v42, %v1705_v45  ;;  %853 = vst.msk [vmem:[#allocation2 + $0x10] sm:$0xff] %vm322_vm2, %v1705_v45  ;;  %577 = vperm.xlu1 %1421, %v1705_v45  }
 0x178   : > { %v548_v48 = vpop.xlane.xlu1 %547 }
 0x179   : > { %v1715_v49 = vmax.f32 %v1707_v46, %v548_v48  ;;  %v561_v22 = vmul.f32 1.442695, %v555_v47  ;;  %v899_v47 = vld [vmem:[%s1858_s3] sm:$0xf] }
 0x17a   : > { %v904_v48 = vsel %vm661_vm3, %v899_v47, 0  ;;  %v1251_v47 = vld [vmem:[%s1859_s4] ss:$0 sm:$0xff] }
 0x17b   : > { %v556_v51 = vsub.f32 %v1707_v46, %v1715_v49  ;;  %854 = vst.msk [vmem:[#allocation2 + $0x18] sm:$0xff] %vm322_vm2, %v1715_v49  ;;  %582 = vperm.xlu1 %1421, %v1715_v49  }
 0x17d   : > { %v563_v23 = vmul.f32 1.442695, %v556_v51 }
 0x1ea   : > { %v568_v55 = vpop.permute.xlu0 %567 }
 0x1eb   : > { %v585_v56 = vsub.f32 %v1672_v14, %v568_v55 }
 0x1ed   : > { %v589_v57 = vmul.f32 1.442695, %v585_v56 }
 0x1ee   : > { %v573_v58 = vpop.permute.xlu1 %572 }
 0x1ef   : > { %1422 = vpow2.f32 %v589_v57  ;;  %v586_v59 = vsub.f32 %v1674_v15, %v573_v58  ;;  %v626_v57 = vld [vmem:[#allocation4] sm:$0xff] }
 0x1f1   : > { %v591_v60 = vmul.f32 1.442695, %v586_v59  ;;  %v627_v59 = vld [vmem:[#allocation4 + $0x8] sm:$0xff] }
 0x1f2   : > { %v578_v61 = vpop.permute.xlu1 %577 }
 0x1f3   : > { %1424 = vpow2.f32 %v591_v60  ;;  %v587_v62 = vsub.f32 %v481_v24, %v578_v61 }
 0x1f5   : > { %v593_v63 = vmul.f32 1.442695, %v587_v62 }
 0x1f6   : > { %v583_v1 = vpop.permute.xlu1 %582 }
 0x1f7   : > { %1426 = vpow2.f32 %v593_v63  ;;  %v588_v2 = vsub.f32 %v527_v25, %v583_v1 }
 0x1f9   : > { %v595_v3 = vmul.f32 1.442695, %v588_v2 }
 0x1fb   : > { %1428 = vpow2.f32 %v595_v3  ;;  %v628_v3 = vld [vmem:[#allocation4 + $0x10] sm:$0xff] }
 0x1fc   : > { %v1423_v5 = vpop.eup %1422  ;;  %1430 = vpow2.f32 %v559_v17 }
 0x1fd   : > { %v605_v6 = vsel %vm331_vm0, %v1423_v5, 0.0  ;;  %v654_v7 = vpack.c.bf16 %v1423_v5, %v1423_v5  ;;  %1432 = vpow2.f32 %v557_v19 }
 0x1fe   : > { %606 = vadd.xlane.f32.xlu1 %v605_v6  ;;  %1434 = vpow2.f32 %v561_v22 }
 0x1ff   : > { %1316 = vmatmul.mubr.msk.bf16.vlgmr.msra.gmra.mxu0 %vm331_vm0, %v654_v7  ;;  %1436 = vpow2.f32 %v563_v23 }
 0x200   : > { %v1425_v10 = vpop.eup %1424  ;;  %1326 = vmatpush3.bf16.msra.mxu0 %v755_v8  ;;  %1327 = vmatprep.mubr.msk.bf16.mxu0 %vm1525_vm1, %v1524_v0 }
 0x201   : > { %v608_v11 = vsel %vm331_vm0, %v1425_v10, 0.0  ;;  %v655_v12 = vpack.c.bf16 %v1425_v10, %v1425_v10  ;;  %1337 = vmatprep.subr.bf16.mxu0 %v1524_v0 }
 0x202   : > { %609 = vadd.xlane.f32.xlu0 %v608_v11  ;;  %v629_v11 = vld [vmem:[#allocation4 + $0x18] sm:$0xff] }
 0x203   : > { %1322 = vmatmul.mubr.msk.bf16.vlgmr.msra.gmra.mxu1 %vm331_vm0, %v655_v12 }
 0x204   : > { %v1427_v14 = vpop.eup %1426  ;;  %1332 = vmatpush3.bf16.msra.mxu1 %v801_v13  ;;  %1333 = vmatprep.mubr.msk.bf16.mxu1 %vm1525_vm1, %v1524_v0 }
 0x205   : > { %v611_v15 = vsel %vm331_vm0, %v1427_v14, 0.0  ;;  %v656_v16 = vpack.c.bf16 %v1427_v14, %v1427_v14  ;;  %1343 = vmatprep.subr.bf16.mxu1 %v1524_v0 }
 0x206   : > { %612 = vadd.xlane.f32.xlu1 %v611_v15 }
 0x207   : > { %1328 = vmatmul.mubr.msk.bf16.vlgmr.msra.gmra.mxu0 %vm331_vm0, %v656_v16 }
 0x208   : > { %v1429_v18 = vpop.eup %1428  ;;  %1339 = vmatprep.mubr.msk.bf16.mxu0 %vm1525_vm1, %v1524_v0  ;;  %1338 = vmatpush3.bf16.msra.mxu0 %v904_v48 }
 0x209   : > { %v614_v20 = vsel %vm331_vm0, %v1429_v18, 0.0  ;;  %v657_v21 = vpack.c.bf16 %v1429_v18, %v1429_v18  ;;  %v1431_v24 = vpop.eup %1430  ;;  %1349 = vmatprep.subr.bf16.mxu0 %v1524_v0 }
 0x20a   : > { %615 = vadd.xlane.f32.xlu1 %v614_v20  ;;  %v1433_v25 = vpop.eup %1432  ;;  %v602_v33 = vmul.f32 %v1431_v24, %v598_v31 }
 0x20b   : > { %1334 = vmatmul.mubr.msk.bf16.vlgmr.msra.gmra.mxu1 %vm331_vm0, %v657_v21  ;;  %v1435_v26 = vpop.eup %1434  ;;  %v601_v29 = vmul.f32 %v1433_v25, %v597_v28 }
 0x20c   : > { %1345 = vmatprep.mubr.msk.bf16.mxu1 %vm1525_vm1, %v1524_v0  ;;  %v1437_v27 = vpop.eup %1436  ;;  %v603_v37 = vmul.f32 %v1435_v26, %v599_v35  ;;  %1344 = vmatpush3.bf16.msra.mxu1 %v959_v52 }
 0x20d   : > { %v604_v42 = vmul.f32 %v1437_v27, %v600_v39  ;;  %1355 = vmatprep.subr.bf16.mxu1 %v1524_v0 }
 0x218   : > { %637 = vperm.xlu0 %1420, %v1431_v24  }
 0x21b   : > { %632 = vperm.xlu1 %1421, %v1433_v25  }
 0x21f   : > { %642 = vperm.xlu1 %1421, %v1435_v26  }
 0x223   : > { %647 = vperm.xlu1 %1421, %v1437_v27   ;;  %v1254_v27 = vld [vmem:[%s1858_s3 + $0x8] sm:$0xf] }
 0x287   : > { %v607_v30 = vpop.xlane.xlu1 %606 }
 0x288   : > { %v617_v32 = vadd.f32 %v607_v30, %v601_v29  ;;  %v1008_v30 = vsel %vm661_vm3, %v1254_v27, 0 }
 0x28a   : > { %622 = vst.msk [vmem:[#allocation3] sm:$0xff] %vm322_vm2, %v617_v32 }
 0x28b   : > { %v610_v34 = vpop.xlane.xlu0 %609 }
 0x28c   : > { %v618_v36 = vadd.f32 %v610_v34, %v602_v33  ;;  %v1256_v33 = vld [vmem:[%s1858_s3 + $0xc] sm:$0xf] }
 0x28e   : > { %623 = vst.msk [vmem:[#allocation3 + $0x8] sm:$0xff] %vm322_vm2, %v618_v36  ;;  %v1057_v36 = vsel %vm661_vm3, %v1256_v33, 0 }
 0x28f   : > { %v613_v38 = vpop.xlane.xlu1 %612 }
 0x290   : > { %v619_v40 = vadd.f32 %v613_v38, %v603_v37 }
 0x291   : > { %v858_v41 = vld [vmem:[#allocation3] sm:$0xff] }
 0x292   : > { %624 = vst.msk [vmem:[#allocation3 + $0x10] sm:$0xff] %vm322_vm2, %v619_v40  ;;  %1438 = vrcp.f32 %v858_v41 }
 0x293   : > { %v616_v43 = vpop.xlane.xlu1 %615  ;;  %v638_v60 = vpop.permute.xlu0 %637 }
 0x294   : > { %v620_v44 = vadd.f32 %v616_v43, %v604_v42  ;;  %v651_v2 = vmul.f32 %v638_v60, %v627_v59 }
 0x295   : > { %v859_v45 = vld [vmem:[#allocation3 + $0x8] sm:$0xff] }
 0x296   : > { %625 = vst.msk [vmem:[#allocation3 + $0x18] sm:$0xff] %vm322_vm2, %v620_v44  ;;  %1440 = vrcp.f32 %v859_v45 }
 0x297   : > { %v633_v56 = vpop.permute.xlu1 %632 }
 0x298   : > { %v650_v58 = vmul.f32 %v633_v56, %v626_v57 }
 0x299   : > { %v860_v46 = vld [vmem:[#allocation3 + $0x10] sm:$0xff] }
 0x29a   : > { %1442 = vrcp.f32 %v860_v46 }
 0x29b   : > { %v643_v62 = vpop.permute.xlu1 %642 }
 0x29c   : > { %v652_v9 = vmul.f32 %v643_v62, %v628_v3 }
 0x29d   : > { %v861_v49 = vld [vmem:[#allocation3 + $0x18] sm:$0xff] }
 0x29e   : > { %1444 = vrcp.f32 %v861_v49 }
 0x29f   : > { %v1439_v51 = vpop.eup %1438  ;;  %v648_v10 = vpop.permute.xlu1 %647 }
 0x2a0   : > { %872 = vperm.xlu1 %1421, %v1439_v51   ;;  %v653_v17 = vmul.f32 %v648_v10, %v629_v11 }
 0x2a3   : > { %v1441_v53 = vpop.eup %1440 }
 0x2a4   : > { %877 = vperm.xlu0 %1420, %v1441_v53  }
 0x2a7   : > { %v1443_v54 = vpop.eup %1442 }
 0x2a8   : > { %882 = vperm.xlu1 %1421, %v1443_v54  }
 0x2ab   : > { %v1445_v55 = vpop.eup %1444 }
 0x2ac   : > { %887 = vperm.xlu0 %1420, %v1445_v55  }
 0x2bf   : > { %v699_v61 = vpop.f32.mrf.mxu0 }
 0x2c0   : > { %v843_v63 = vadd.f32 %v699_v61, %v650_v58 }
 0x2c1   : > { %v1317_v1 = vpop.f32.mrf.mxu0 }
 0x2c2   : > { %847 = vst.msk [vmem:[#allocation4] sm:$0xff] %vm331_vm0, %v843_v63 }
 0x2c3   : > { %v702_v4 = vpop.f32.mrf.mxu0  ;;  %v745_v5 = vpop.f32.mrf.mxu1 }
 0x2c4   : > { %v844_v6 = vadd.f32 %v745_v5, %v651_v2 }
 0x2c5   : > { %v1318_v7 = vpop.f32.mrf.mxu0  ;;  %v1323_v8 = vpop.f32.mrf.mxu1 }
 0x2c6   : > { %848 = vst.msk [vmem:[#allocation4 + $0x8] sm:$0xff] %vm331_vm0, %v844_v6 }
 0x2c7   : > { %v748_v12 = vpop.f32.mrf.mxu1  ;;  %v791_v13 = vpop.f32.mrf.mxu0 }
 0x2c8   : > { %v845_v14 = vadd.f32 %v791_v13, %v652_v9 }
 0x2c9   : > { %v1324_v15 = vpop.f32.mrf.mxu1  ;;  %v1329_v16 = vpop.f32.mrf.mxu0  ;;  %v866_v26 = vld [vmem:[#allocation4] sm:$0xff] }
 0x2ca   : > { %849 = vst.msk [vmem:[#allocation4 + $0x10] sm:$0xff] %vm331_vm0, %v845_v14 }
 0x2cb   : > { %v794_v18 = vpop.f32.mrf.mxu0  ;;  %v837_v19 = vpop.f32.mrf.mxu1 }
 0x2cc   : > { %v846_v20 = vadd.f32 %v837_v19, %v653_v17 }
 0x2cd   : > { %v1330_v21 = vpop.f32.mrf.mxu0  ;;  %v1335_v22 = vpop.f32.mrf.mxu1  ;;  %v867_v31 = vld [vmem:[#allocation4 + $0x8] sm:$0xff] }
 0x2ce   : > { %850 = vst.msk [vmem:[#allocation4 + $0x18] sm:$0xff] %vm331_vm0, %v846_v20 }
 0x2cf   : > { %v840_v23 = vpop.f32.mrf.mxu1 }
 0x2d1   : > { %v1336_v24 = vpop.f32.mrf.mxu1  ;;  %v868_v38 = vld [vmem:[#allocation4 + $0x10] sm:$0xff] }
 0x2d5   : > { %v869_v42 = vld [vmem:[#allocation4 + $0x18] sm:$0xff] }
 0x31b   : > { %v873_v25 = vpop.permute.xlu1 %872 }
 0x31c   : > { %v890_v28 = vmul.f32 %v873_v25, %v866_v26 }
 0x31e   : > { %v894_v29 = vpack.c.bf16 %v890_v28, %v890_v28 }
 0x31f   : > { %v878_v32 = vpop.permute.xlu0 %877 }
 0x320   : > { %v891_v34 = vmul.f32 %v878_v32, %v867_v31  ;;  %1340 = vmatmul.mubr.msk.bf16.vlgmr.msra.gmra.mxu0 %vm331_vm0, %v894_v29 }
 0x321   : > { %1350 = vmatpush3.bf16.msra.mxu0 %v1008_v30  ;;  %1351 = vmatprep.mubr.msk.bf16.mxu0 %vm1525_vm1, %v1524_v0 }
 0x322   : > { %v895_v35 = vpack.c.bf16 %v891_v34, %v891_v34 }
 0x323   : > { %v883_v37 = vpop.permute.xlu1 %882 }
 0x324   : > { %v892_v39 = vmul.f32 %v883_v37, %v868_v38  ;;  %1346 = vmatmul.mubr.msk.bf16.vlgmr.msra.gmra.mxu1 %vm331_vm0, %v895_v35 }
 0x325   : > { %1356 = vmatpush3.bf16.msra.mxu1 %v1057_v36  ;;  %1357 = vmatprep.mubr.msk.bf16.mxu1 %vm1525_vm1, %v1524_v0 }
 0x326   : > { %v896_v40 = vpack.c.bf16 %v892_v39, %v892_v39 }
 0x327   : > { %v888_v41 = vpop.permute.xlu0 %887 }
 0x328   : > { %v893_v43 = vmul.f32 %v888_v41, %v869_v42  ;;  %1352 = vmatmul.mubr.msk.bf16.vlgmr.msra.gmra.mxu0 %vm331_vm0, %v896_v40 }
 0x32a   : > { %v897_v44 = vpack.c.bf16 %v893_v43, %v893_v43 }
 0x32c   : > { %1358 = vmatmul.mubr.msk.bf16.vlgmr.msra.gmra.mxu1 %vm331_vm0, %v897_v44 }
 0x3e0   : > { %v940_v45 = vpop.f32.mrf.mxu0 }
 0x3e1   : > { %v952_v51 = vadd.f32 %v1251_v47, %v940_v45 }
 0x3e2   : > { %v1341_v46 = vpop.f32.mrf.mxu0 }
 0x3e4   : > { %v943_v48 = vpop.f32.mrf.mxu0  ;;  %v995_v49 = vpop.f32.mrf.mxu1 }
 0x3e5   : > { %v1001_v54 = vadd.f32 %v995_v49, %v952_v51 }
 0x3e6   : > { %v1342_v0 = vpop.f32.mrf.mxu0  ;;  %v1347_v50 = vpop.f32.mrf.mxu1 }
 0x3e8   : > { %v998_v52 = vpop.f32.mrf.mxu1  ;;  %v1044_v53 = vpop.f32.mrf.mxu0 }
 0x3e9   : > { %v1050_v57 = vadd.f32 %v1044_v53, %v1001_v54 }
 0x3ea   : > { %v1348_v55 = vpop.f32.mrf.mxu1  ;;  %v1353_v56 = vpop.f32.mrf.mxu0 }
 0x3ec   : > { %v1047_v58 = vpop.f32.mrf.mxu0  ;;  %v1093_v59 = vpop.f32.mrf.mxu1 }
 0x3ed   : > { %v1099_v60 = vadd.f32 %v1093_v59, %v1050_v57 }
 0x3ee   : > { %v1354_v61 = vpop.f32.mrf.mxu0  ;;  %v1359_v62 = vpop.f32.mrf.mxu1 }
 0x3ef   : > { %1101 = vst.msk [vmem:[%s292_s16] sm:$0xff] %vm1100_vm4, %v1099_v60 }
 0x3f0   : > { %v1096_v63 = vpop.f32.mrf.mxu1 }
 0x3f1   : > { %1459 = shalt.err (!%p1456_p5)
}
 0x3f2   : > { %s1460_s10 = scalar_lea.hbm %s1809_s27, 128  ;;  %s1464_s13 = scalar_lea.hbm %s1860_s5, 256 }
 0x3f3   : > { %p1461_p6 = scmp.ne.s32.totalorder %s1809_s27, %s1460_s10  ;;  %p1465_p10 = scmp.lt.s32.totalorder %s1809_s27, %s1860_s5 }
 0x3f4   : > { %p1466_p11 = scmp.lt.s32.totalorder %s1464_s13, %s1460_s10 }
 0x3f5   : > { %p1462_p7 = pnand %p1461_p6, %p1599_p4 }
 0x3f6   : > { %p1467_p12 = por %p1466_p11, %p1465_p10 }
 0x3f7   : > { %p1463_p9 = pneg %p1462_p7 }
 0x3f9   : > { %p1468_p13 = pnand %p1467_p12, %p1463_p9 }
 0x3fb   : > { %1471 = shalt.err (!%p1468_p13)
}
 0x3fc   : > { %1361 = dma.vmem_to_hbm [thread:$0]  (%p1599_p4), %s1811_s17, 128, %s1809_s27, %s1103_s21   ;;  %v1360_v1 = vpop.f32.mrf.mxu1 }
 0x3fd PF: > { %p1367_p0 = scmp.ge.s32.totalorder %s1522_s23, 2  ;;  %s1129_s16 = sand.u32 1, %s1502_s18  }
 0x3fe   : > { %s1130_s24 = scalar_lea.sflag [#allocation6], %s1129_s16 }
 0x3ff   : > { %p1364_p1 = pnand %p1367_p0, %p1606_p8 }
 0x401   : > { %p1365_p2 = pneg %p1364_p1 }
 0x403   : > { %1497 = dma.done.wait (%p1365_p2), %s1130_s24, 128  }
 0x404   : > { %1499 = vsyncadd (%p1365_p2), %s1130_s24, 4294967168  ;;  %s18_s23 = sadd.s32 1, %s1522_s23   ;;  %s1863_s18 = smov %s1506_s19 }
 0x405   : > { %p15_p3 = scmp.ge.s32.totalorder %s18_s23, 4   ;;  %s1864_s19 = smov %s1510_s20 }
 0x406   : > { %s1865_s20 = smov %s1612_s6  ;;  %s1866_s21 = smov %s1518_s22 }
 0x407   : > { %s1867_s22 = smov %s1869_s26  ;;  %17 = sbr.rel (!%p15_p3) target bundleno = 4 (0x4), region = 92 }
 0x40c   :  { %1135 = vsyncpa [#allocation6], 1 }
 0x40d   :  { %1137 = vsyncpa [#allocation6 + $0x1], 1 }

</bundles_post_ra>
